<compile_context>
chip_gen: v5e
topology: v5e:2x2
jax: 0.10.0
libtpu: 0.0.40
codegen_flags: <defaults>
</compile_context>

<pallas_src>
import functools

import jax
import jax.numpy as jnp
from jax.experimental import pallas as pl
from jax.experimental.pallas import tpu as pltpu


def policy_net_kernel(x_ref, w1_ref, b1_ref, w2_ref, b2_ref, w3_ref, b3_ref, o_ref):
    # fc1 + ReLU (f32 accumulation on the MXU regardless of operand dtype).
    h1 = jnp.dot(x_ref[...], w1_ref[...], preferred_element_type=jnp.float32)
    h1 = jnp.maximum(h1 + b1_ref[...], 0.0)
    # fc2 + ReLU
    h2 = jnp.dot(h1.astype(w2_ref.dtype), w2_ref[...], preferred_element_type=jnp.float32)
    h2 = jnp.maximum(h2 + b2_ref[...], 0.0)
    # fc3 (no activation). Output stays unpadded [TILE_B, A]: same number of
    # store instructions as the lane-padded variant, but ~16x less HBM writeback.
    out = jnp.dot(h2.astype(w3_ref.dtype), w3_ref[...], preferred_element_type=jnp.float32)
    o_ref[...] = (out + b3_ref[...]).astype(o_ref.dtype)


def _round_up(a, b):
    return ((a + b - 1) // b) * b


@functools.partial(jax.jit, static_argnames=("tile_b", "use_bf16"))
def policy_network_forward(x, params, *, tile_b=2048, use_bf16=True):
    """x: [B, state_size]. params: dict of w1,b1,w2,b2,w3,b3 (W as [in, out], b as [1, out])."""
    w1, b1, w2, b2, w3, b3 = (
        params["w1"], params["b1"], params["w2"],
        params["b2"], params["w3"], params["b3"],
    )
    B, S = x.shape
    H = w1.shape[1]
    A = w3.shape[1]

    # --- optional bf16 matmul operands (f32 accumulation kept inside the kernel).
    if use_bf16:
        x = x.astype(jnp.bfloat16)
        w1 = w1.astype(jnp.bfloat16)
        w2 = w2.astype(jnp.bfloat16)
        w3 = w3.astype(jnp.bfloat16)
        # biases stay f32: they are added to the f32 accumulator.

    # --- batch tiling.
    sub = 16 if use_bf16 else 8          # sublane rows per vreg for the operand dtype
    B_sub = _round_up(B, sub)
    TILE_B = min(tile_b, B_sub)
    if B_sub >= 2 * sub:
        # Ensure >=2 grid steps so "parallel" can shard the batch across the
        # two TensorCores on v7x (harmless on v5e/v6e which have a single TC).
        TILE_B = min(TILE_B, _round_up((B_sub + 1) // 2, sub))
    TILE_B = _round_up(TILE_B, sub)
    B_pad = _round_up(B_sub, TILE_B)
    if B_pad != B:
        x = jnp.pad(x, ((0, B_pad - B), (0, 0)))

    grid = (B_pad // TILE_B,)

    # Advisory cost estimate so XLA can schedule/overlap around the custom call.
    cost = pl.CostEstimate(
        flops=2 * B_pad * (S * H + H * H + H * A),
        transcendentals=0,
        bytes_accessed=(
            x.size * x.dtype.itemsize
            + sum(a.size * a.dtype.itemsize for a in (w1, b1, w2, b2, w3, b3))
            + B_pad * A * 4
        ),
    )

    const = lambda i: (0, 0)

    def resident(shape):
        # Weights/biases never change block across the grid: keep them
        # VMEM-resident and single-buffered (no useless second DMA buffer).
        return pl.BlockSpec(shape, const, pipeline_mode=pl.Buffered(1))

    out = pl.pallas_call(
        policy_net_kernel,
        out_shape=jax.ShapeDtypeStruct((B_pad, A), jnp.float32),
        grid_spec=pltpu.PrefetchScalarGridSpec(
            num_scalar_prefetch=0,
            grid=grid,
            in_specs=[
                pl.BlockSpec((TILE_B, S), lambda i: (i, 0)),  # x: streamed over batch
                resident((S, H)),                             # w1
                resident((1, H)),                             # b1 (f32)
                resident((H, H)),                             # w2
                resident((1, H)),                             # b2 (f32)
                resident((H, A)),                             # w3 (unpadded)
                resident((1, A)),                             # b3 (f32, unpadded)
            ],
            out_specs=pl.BlockSpec((TILE_B, A), lambda i: (i, 0)),
        ),
        compiler_params=pltpu.CompilerParams(
            # Batch grid axis is independent -> shards across TCs on v7x.
            # Note: if tile_b is pushed past ~8K rows, also set vmem_limit_bytes
            # explicitly (v7x scoped default is 32MiB of a 64MiB pool).
            dimension_semantics=("parallel",),
        ),
        cost_estimate=cost,
    )(x, w1, b1, w2, b2, w3, b3)

    # strip batch padding; output columns are already exactly action_size wide.
    return out[:B]


def init_params(key, state_size, action_size, hidden_size=128):
    """Deterministic init mimicking nn.Linear default (uniform +/- 1/sqrt(fan_in))."""
    ks = jax.random.split(key, 6)

    def lin(kw, kb, fan_in, fan_out):
        bound = 1.0 / jnp.sqrt(fan_in)
        w = jax.random.uniform(kw, (fan_in, fan_out), jnp.float32, -bound, bound)
        b = jax.random.uniform(kb, (1, fan_out), jnp.float32, -bound, bound)
        return w, b

    w1, b1 = lin(ks[0], ks[1], state_size, hidden_size)
    w2, b2 = lin(ks[2], ks[3], hidden_size, hidden_size)
    w3, b3 = lin(ks[4], ks[5], hidden_size, action_size)
    return {"w1": w1, "b1": b1, "w2": w2, "b2": b2, "w3": w3, "b3": b3}


def reference_forward(x, p):
    h1 = jnp.maximum(x @ p["w1"] + p["b1"], 0.0)
    h2 = jnp.maximum(h1 @ p["w2"] + p["b2"], 0.0)
    return h2 @ p["w3"] + p["b3"]


if __name__ == "__main__":
    key = jax.random.PRNGKey(0)
    k_params, k_x, k_x2, k_x3 = jax.random.split(key, 4)

    state_size = 16
    action_size = 8
    hidden_size = 128
    params = init_params(k_params, state_size, action_size, hidden_size)

    # 1) f32 path, tiny batch (grid of 1): tight check vs. pure-JAX reference.
    x = jax.random.normal(k_x, (8, state_size), jnp.float32)
    out = jax.block_until_ready(policy_network_forward(x, params, use_bf16=False))
    ref = reference_forward(x, params)
    assert out.shape == (8, action_size)
    assert jnp.allclose(out, ref, atol=1e-5, rtol=1e-5)

    # 2) batch not a multiple of the sublane granularity (exercises padding + slicing).
    x2 = jax.random.normal(k_x2, (5, state_size), jnp.float32)
    out2 = jax.block_until_ready(policy_network_forward(x2, params, use_bf16=False))
    ref2 = reference_forward(x2, params)
    assert out2.shape == (5, action_size)
    assert jnp.allclose(out2, ref2, atol=1e-5, rtol=1e-5)

    # 3) default path: bf16 operands (f32 accumulate), >=2 grid steps (megacore split).
    x3 = jax.random.normal(k_x3, (40, state_size), jnp.float32)
    out3 = jax.block_until_ready(policy_network_forward(x3, params))
    ref3 = reference_forward(x3, params)
    assert out3.shape == (40, action_size)
    assert jnp.allclose(out3, ref3, atol=5e-2, rtol=5e-2)

    print("KERNEL_OK")
</pallas_src>

<mosaic_0001>
module attributes {stable_mosaic.version = 11 : i64} {
  func.func @policy_net_kernel(%arg0: i32, %arg1: memref<8x16xf32, #tpu.memory_space<vmem>>, %arg2: memref<16x128xf32, #tpu.memory_space<vmem>>, %arg3: memref<1x128xf32, #tpu.memory_space<vmem>>, %arg4: memref<128x128xf32, #tpu.memory_space<vmem>>, %arg5: memref<1x128xf32, #tpu.memory_space<vmem>>, %arg6: memref<128x8xf32, #tpu.memory_space<vmem>>, %arg7: memref<1x8xf32, #tpu.memory_space<vmem>>, %arg8: memref<8x8xf32, #tpu.memory_space<vmem>>) attributes {dimension_semantics = [#tpu.dimension_semantics<parallel>], iteration_bounds = array<i64: 1>, scalar_prefetch = 0 : i64, scratch_operands = 0 : i64, tpu.core_type = #tpu.core_type<tc>, window_params = [{transform_indices = @transform_0, window_bounds = array<i64: 8, 16>}, {pipeline_mode = #tpu.pipeline_mode<synchronous>, transform_indices = @transform_1, window_bounds = array<i64: 16, 128>}, {pipeline_mode = #tpu.pipeline_mode<synchronous>, transform_indices = @transform_2, window_bounds = array<i64: 1, 128>}, {pipeline_mode = #tpu.pipeline_mode<synchronous>, transform_indices = @transform_3, window_bounds = array<i64: 128, 128>}, {pipeline_mode = #tpu.pipeline_mode<synchronous>, transform_indices = @transform_4, window_bounds = array<i64: 1, 128>}, {pipeline_mode = #tpu.pipeline_mode<synchronous>, transform_indices = @transform_5, window_bounds = array<i64: 128, 8>}, {pipeline_mode = #tpu.pipeline_mode<synchronous>, transform_indices = @transform_6, window_bounds = array<i64: 1, 8>}, {transform_indices = @transform_7, window_bounds = array<i64: 8, 8>}]} {
    %c0 = arith.constant 0 : index
    %c0_0 = arith.constant 0 : index
    %0 = vector.load %arg1[%c0, %c0_0] : memref<8x16xf32, #tpu.memory_space<vmem>>, vector<8x16xf32>
    %c0_1 = arith.constant 0 : index
    %c0_2 = arith.constant 0 : index
    %1 = vector.load %arg2[%c0_1, %c0_2] : memref<16x128xf32, #tpu.memory_space<vmem>>, vector<16x128xf32>
    %cst = arith.constant dense<0.000000e+00> : vector<8x128xf32>
    %2 = tpu.matmul %0, %1, %cst {dimension_numbers = #tpu.dot_dimension_numbers<[1], [0], [0], [1], [0, 0, 1, 1], [], []>} : vector<8x16xf32>, vector<16x128xf32>, vector<8x128xf32> -> vector<8x128xf32>
    %c0_3 = arith.constant 0 : index
    %c0_4 = arith.constant 0 : index
    %3 = vector.load %arg3[%c0_3, %c0_4] : memref<1x128xf32, #tpu.memory_space<vmem>>, vector<1x128xf32>
    %4 = vector.broadcast %3 : vector<1x128xf32> to vector<8x128xf32>
    %5 = arith.addf %2, %4 : vector<8x128xf32>
    %cst_5 = arith.constant 0.000000e+00 : f32
    %6 = vector.broadcast %cst_5 : f32 to vector<8x128xf32>
    %7 = arith.maximumf %5, %6 : vector<8x128xf32>
    %c0_6 = arith.constant 0 : index
    %c0_7 = arith.constant 0 : index
    %8 = vector.load %arg4[%c0_6, %c0_7] : memref<128x128xf32, #tpu.memory_space<vmem>>, vector<128x128xf32>
    %cst_8 = arith.constant dense<0.000000e+00> : vector<8x128xf32>
    %9 = tpu.matmul %7, %8, %cst_8 {dimension_numbers = #tpu.dot_dimension_numbers<[1], [0], [0], [1], [0, 0, 1, 1], [], []>} : vector<8x128xf32>, vector<128x128xf32>, vector<8x128xf32> -> vector<8x128xf32>
    %c0_9 = arith.constant 0 : index
    %c0_10 = arith.constant 0 : index
    %10 = vector.load %arg5[%c0_9, %c0_10] : memref<1x128xf32, #tpu.memory_space<vmem>>, vector<1x128xf32>
    %11 = vector.broadcast %10 : vector<1x128xf32> to vector<8x128xf32>
    %12 = arith.addf %9, %11 : vector<8x128xf32>
    %cst_11 = arith.constant 0.000000e+00 : f32
    %13 = vector.broadcast %cst_11 : f32 to vector<8x128xf32>
    %14 = arith.maximumf %12, %13 : vector<8x128xf32>
    %c0_12 = arith.constant 0 : index
    %c0_13 = arith.constant 0 : index
    %15 = vector.load %arg6[%c0_12, %c0_13] : memref<128x8xf32, #tpu.memory_space<vmem>>, vector<128x8xf32>
    %cst_14 = arith.constant dense<0.000000e+00> : vector<8x8xf32>
    %16 = tpu.matmul %14, %15, %cst_14 {dimension_numbers = #tpu.dot_dimension_numbers<[1], [0], [0], [1], [0, 0, 1, 1], [], []>} : vector<8x128xf32>, vector<128x8xf32>, vector<8x8xf32> -> vector<8x8xf32>
    %c0_15 = arith.constant 0 : index
    %c0_16 = arith.constant 0 : index
    %17 = vector.load %arg7[%c0_15, %c0_16] : memref<1x8xf32, #tpu.memory_space<vmem>>, vector<1x8xf32>
    %18 = vector.broadcast %17 : vector<1x8xf32> to vector<8x8xf32>
    %19 = arith.addf %16, %18 : vector<8x8xf32>
    %c0_17 = arith.constant 0 : index
    %c0_18 = arith.constant 0 : index
    %20 = vector.load %arg8[%c0_17, %c0_18] : memref<8x8xf32, #tpu.memory_space<vmem>>, vector<8x8xf32>
    tpu.vector_store %arg8[%c0_17, %c0_18], %19 {strides = array<i32>} : memref<8x8xf32, #tpu.memory_space<vmem>>, vector<8x8xf32>,
    return
  }
  func.func @transform_0(%arg0: i32) -> (i32, i32) {
    %c0_i32 = arith.constant 0 : i32
    %c0_i32_0 = arith.constant 0 : i32
    return %arg0, %c0_i32 : i32, i32
  }
  func.func @transform_1(%arg0: i32) -> (i32, i32) {
    %c0_i32 = arith.constant 0 : i32
    %c0_i32_0 = arith.constant 0 : i32
    %c0_i32_1 = arith.constant 0 : i32
    return %c0_i32, %c0_i32_0 : i32, i32
  }
  func.func @transform_2(%arg0: i32) -> (i32, i32) {
    %c0_i32 = arith.constant 0 : i32
    %c0_i32_0 = arith.constant 0 : i32
    %c0_i32_1 = arith.constant 0 : i32
    return %c0_i32, %c0_i32_0 : i32, i32
  }
  func.func @transform_3(%arg0: i32) -> (i32, i32) {
    %c0_i32 = arith.constant 0 : i32
    %c0_i32_0 = arith.constant 0 : i32
    %c0_i32_1 = arith.constant 0 : i32
    return %c0_i32, %c0_i32_0 : i32, i32
  }
  func.func @transform_4(%arg0: i32) -> (i32, i32) {
    %c0_i32 = arith.constant 0 : i32
    %c0_i32_0 = arith.constant 0 : i32
    %c0_i32_1 = arith.constant 0 : i32
    return %c0_i32, %c0_i32_0 : i32, i32
  }
  func.func @transform_5(%arg0: i32) -> (i32, i32) {
    %c0_i32 = arith.constant 0 : i32
    %c0_i32_0 = arith.constant 0 : i32
    %c0_i32_1 = arith.constant 0 : i32
    return %c0_i32, %c0_i32_0 : i32, i32
  }
  func.func @transform_6(%arg0: i32) -> (i32, i32) {
    %c0_i32 = arith.constant 0 : i32
    %c0_i32_0 = arith.constant 0 : i32
    %c0_i32_1 = arith.constant 0 : i32
    return %c0_i32, %c0_i32_0 : i32, i32
  }
  func.func @transform_7(%arg0: i32) -> (i32, i32) {
    %c0_i32 = arith.constant 0 : i32
    %c0_i32_0 = arith.constant 0 : i32
    return %arg0, %c0_i32 : i32, i32
  }
}

</mosaic_0001>

<bundles_post_ra>
// kernel: policy_network_forward.1
= control target key start
LH: loop header
LB: loop body
LE: loop exit
PB: predicated region body
PF: predicated region fallthrough
CT: control target
= control target key end

     0   :  { %12 = vsyncpa [#allocation3], 0  ;;  %s393_s0 = inlined_call_operand.vmem [shape: f32[8,16], index: 0, kind: input, shape index: {}]   ;;  %s394_s1 = inlined_call_operand.hbm [shape: f32[16,128], index: 1, kind: input, shape index: {}]   ;;  %s395_s2 = inlined_call_operand.vmem [shape: f32[1,128], index: 2, kind: input, shape index: {}]   ;;  %s396_s3 = inlined_call_operand.vmem [shape: f32[128,128], index: 3, kind: input, shape index: {}]   ;;  %s397_s4 = inlined_call_operand.vmem [shape: f32[1,128], index: 4, kind: input, shape index: {}]   ;;  %s398_s5 = inlined_call_operand.vmem [shape: f32[128,8], index: 5, kind: input, shape index: {}]   ;;  %s399_s6 = inlined_call_operand.vmem [shape: f32[1,8], index: 6, kind: input, shape index: {}]   ;;  %s400_s7 = inlined_call_operand.hbm [shape: f32[8,8], index: 7, kind: output, shape index: {}]  }
   0x1   :  { %13 = vsyncpa [#allocation4], 0  ;;  %s20_s26 = sshll.u32 %s394_s1, 4  ;;  %s235_s27 = smov [#allocation2]   ;;  %s21_s26 = int_to_ptr.hbm [resolvable:$true] %s20_s26 }
   0x2   :  { %s22_s28 = sshll.u32 %s235_s27, 4  ;;  %s236_s29 = smov 128   ;;  %s23_s28 = int_to_ptr.vmem [resolvable:$true] %s22_s28 }
   0x3   :  { %s237_s30 = smov 8  }
   0x4   :  { %28 = dma.hbm_to_vmem [thread:$0]  %s21_s26, 256, %s23_s28, [#allocation3], %s236_s29, %s236_s29, %s237_s30  }
   0x5   :  { %231 = dma.done.wait [#allocation3], 256  }
   0x6   :  { %232 = vsyncadd [#allocation3], 4294967040  ;;  %v45_v0 = vld [vmem:[#allocation2 + $0x8] sm:$0xff]  ;;  %v44_v1 = vld [vmem:[#allocation2] sm:$0xff]  ;;  %vm50_vm0 = vcmask 130048   ;;  %s238_s25 = smov [#allocation5]  }
   0x7   :  { %68 = vmatpush.msra.mxu0 %v45_v0  ;;  %v43_v2 = vld [vmem:[%s393_s0] sm:$0xff]  ;;  %v90_v3 = vld [vmem:[%s396_s3 + $0x78] sm:$0xff]  ;;  %v89_v4 = vld [vmem:[%s396_s3 + $0x70] sm:$0xff]  ;;  %s163_s26 = sshll.u32 %s238_s25, 4  ;;  %s165_s29 = sshll.u32 %s400_s7, 4  ;;  %vm156_vm1 = vcmask 64512   ;;  %s164_s26 = int_to_ptr.vmem [resolvable:$true] %s163_s26  ;;  %s166_s29 = int_to_ptr.hbm [resolvable:$true] %s165_s29 }
   0x8   :  { %95 = vmatpush.msra.mxu1 %v90_v3  ;;  %v88_v5 = vld [vmem:[%s396_s3 + $0x68] sm:$0xff]  ;;  %v87_v6 = vld [vmem:[%s396_s3 + $0x60] sm:$0xff]  ;;  %v86_v7 = vld [vmem:[%s396_s3 + $0x58] sm:$0xff] }
   0x9   :  { %69 = vmatpush.msra.mxu0 %v44_v1  ;;  %v85_v8 = vld [vmem:[%s396_s3 + $0x50] sm:$0xff]  ;;  %v84_v9 = vld [vmem:[%s396_s3 + $0x48] sm:$0xff]  ;;  %v83_v10 = vld [vmem:[%s396_s3 + $0x40] sm:$0xff] }
   0xa   :  { %175 = vmatmul.msk.f32.vlgmr.msra.gmra.mxu0 %vm50_vm0, %v43_v2  ;;  %96 = vmatpush.msra.mxu1 %v89_v4  ;;  %v82_v11 = vld [vmem:[%s396_s3 + $0x38] sm:$0xff]  ;;  %v81_v12 = vld [vmem:[%s396_s3 + $0x30] sm:$0xff]  ;;  %v80_v13 = vld [vmem:[%s396_s3 + $0x28] sm:$0xff] }
   0xb   :  { %v79_v14 = vld [vmem:[%s396_s3 + $0x20] sm:$0xff]  ;;  %v78_v15 = vld [vmem:[%s396_s3 + $0x18] sm:$0xff]  ;;  %v77_v16 = vld [vmem:[%s396_s3 + $0x10] sm:$0xff] }
   0xc   :  { %97 = vmatpush.msra.mxu1 %v88_v5  ;;  %v76_v17 = vld [vmem:[%s396_s3 + $0x8] sm:$0xff]  ;;  %v75_v18 = vld [vmem:[%s396_s3] sm:$0xff]  ;;  %v131_v19 = vld [vmem:[%s398_s5 + $0x78] sm:$0xff] }
   0xd   :  { %v130_v20 = vld [vmem:[%s398_s5 + $0x70] sm:$0xff]  ;;  %136 = vmatpush.msra.mxu2 %v131_v19  ;;  %v129_v21 = vld [vmem:[%s398_s5 + $0x68] sm:$0xff]  ;;  %v128_v22 = vld [vmem:[%s398_s5 + $0x60] sm:$0xff] }
   0xe   :  { %98 = vmatpush.msra.mxu1 %v87_v6  ;;  %v127_v23 = vld [vmem:[%s398_s5 + $0x58] sm:$0xff]  ;;  %v126_v24 = vld [vmem:[%s398_s5 + $0x50] sm:$0xff]  ;;  %v125_v25 = vld [vmem:[%s398_s5 + $0x48] sm:$0xff] }
   0xf   :  { %137 = vmatpush.msra.mxu2 %v130_v20  ;;  %v124_v26 = vld [vmem:[%s398_s5 + $0x40] sm:$0xff]  ;;  %v123_v27 = vld [vmem:[%s398_s5 + $0x38] sm:$0xff]  ;;  %v122_v28 = vld [vmem:[%s398_s5 + $0x30] sm:$0xff] }
  0x10   :  { %99 = vmatpush.msra.mxu1 %v86_v7  ;;  %v121_v29 = vld [vmem:[%s398_s5 + $0x28] sm:$0xff]  ;;  %v120_v30 = vld [vmem:[%s398_s5 + $0x20] sm:$0xff]  ;;  %v119_v31 = vld [vmem:[%s398_s5 + $0x18] sm:$0xff] }
  0x11   :  { %138 = vmatpush.msra.mxu2 %v129_v21  ;;  %v180_v32 = vld [vmem:[%s395_s2] ss:$0 sm:$0xff]  ;;  %v118_v36 = vld [vmem:[%s398_s5 + $0x10] sm:$0xff]  ;;  %v117_v37 = vld [vmem:[%s398_s5 + $0x8] sm:$0xff] }
  0x12   :  { %100 = vmatpush.msra.mxu1 %v85_v8  ;;  %v116_v38 = vld [vmem:[%s398_s5] sm:$0xff] }
  0x13   :  { %139 = vmatpush.msra.mxu2 %v128_v22  ;;  %v181_v39 = vld [vmem:[%s397_s4] ss:$0 sm:$0xff] }
  0x14   :  { %101 = vmatpush.msra.mxu1 %v84_v9  ;;  %v182_v43 = vld [vmem:[%s399_s6] ss:$0 sm:$0xff] }
  0x15   :  { %140 = vmatpush.msra.mxu2 %v127_v23 }
  0x16   :  { %102 = vmatpush.msra.mxu1 %v83_v10 }
  0x17   :  { %141 = vmatpush.msra.mxu2 %v126_v24 }
  0x18   :  { %103 = vmatpush.msra.mxu1 %v82_v11 }
  0x19   :  { %142 = vmatpush.msra.mxu2 %v125_v25 }
  0x1a   :  { %104 = vmatpush.msra.mxu1 %v81_v12 }
  0x1b   :  { %143 = vmatpush.msra.mxu2 %v124_v26 }
  0x1c   :  { %105 = vmatpush.msra.mxu1 %v80_v13 }
  0x1d   :  { %144 = vmatpush.msra.mxu2 %v123_v27 }
  0x1e   :  { %106 = vmatpush.msra.mxu1 %v79_v14 }
  0x1f   :  { %145 = vmatpush.msra.mxu2 %v122_v28 }
  0x20   :  { %107 = vmatpush.msra.mxu1 %v78_v15 }
  0x21   :  { %146 = vmatpush.msra.mxu2 %v121_v29 }
  0x22   :  { %108 = vmatpush.msra.mxu1 %v77_v16 }
  0x23   :  { %147 = vmatpush.msra.mxu2 %v120_v30 }
  0x24   :  { %109 = vmatpush.msra.mxu1 %v76_v17 }
  0x25   :  { %148 = vmatpush.msra.mxu2 %v119_v31 }
  0x26   :  { %110 = vmatpush.msra.mxu1 %v75_v18 }
  0x27   :  { %149 = vmatpush.msra.mxu2 %v118_v36 }
  0x29   :  { %150 = vmatpush.msra.mxu2 %v117_v37 }
  0x2b   :  { %151 = vmatpush.msra.mxu2 %v116_v38 }
  0x87   :  { %v71_v33 = vpop.f32.mrf.mxu0 }
  0x88   :  { %v72_v34 = vadd.f32 %v180_v32, %v71_v33 }
  0x8a   :  { %v74_v35 = vmax.f32 %v72_v34, 0.0 }
  0x8c   :  { %111 = vmatmul.f32.vlgmr.msra.gmra.mxu1 %v74_v35 }
 0x109   :  { %v112_v40 = vpop.f32.mrf.mxu1 }
 0x10a   :  { %v113_v41 = vadd.f32 %v181_v39, %v112_v40 }
 0x10c   :  { %v115_v42 = vmax.f32 %v113_v41, 0.0 }
 0x10e   :  { %152 = vmatmul.f32.vlgmr.msra.gmra.mxu2 %v115_v42 }
 0x191   :  { %v153_v44 = vpop.f32.mrf.mxu2 }
 0x192   :  { %v154_v45 = vadd.f32 %v182_v43, %v153_v44 }
 0x194   :  { %157 = vst.msk [vmem:[#allocation5] sm:$0xff] %vm156_vm1, %v154_v45 }
 0x195   :  { %168 = dma.vmem_to_hbm [thread:$0]  %s164_s26, 128, %s166_s29, [#allocation4]  }
 0x196   :  { %233 = dma.done.wait [#allocation4], 128  }
 0x197   :  { %234 = vsyncadd [#allocation4], 4294967168 }
 0x198   :  { %173 = vsyncpa [#allocation3], 1 }
 0x199   :  { %174 = vsyncpa [#allocation4], 1 }

</bundles_post_ra>
